<compile_context>
chip_gen: v6e
topology: v6e:2x2x1
jax: 0.10.0
libtpu: 0.0.40
codegen_flags: <defaults>
</compile_context>

<pallas_src>
import functools
import math

import jax
import jax.numpy as jnp
from jax.experimental import pallas as pl
from jax.experimental.pallas import tpu as pltpu


_NEG_BIAS = -1e9  # TODO(synk): PyTorch uses -inf for key_padding_mask; -1e9 keeps
                  # fully-padded rows finite (uniform attention) instead of NaN.


# ----------------------------------------------------------------------------
# Small helpers.
# ----------------------------------------------------------------------------
def _vmem_limit_bytes():
    """~96 MiB on 128-MiB chips (v5e/v6e), ~48 MiB on v7x, 64 MiB fallback."""
    try:
        cap = int(pltpu.get_tpu_info().vmem_capacity_bytes)
    except Exception:
        cap = 0
    if cap <= 0:
        return 64 * 1024 * 1024
    return max(32 * 1024 * 1024, min((cap * 3) // 4, 96 * 1024 * 1024))


def _head_group(n_heads, head_dim):
    """Largest divisor Hb of n_heads with Hb*head_dim <= 128 (lane-dense group)."""
    hb = max(1, min(n_heads, 128 // max(head_dim, 1)))
    while n_heads % hb:
        hb -= 1
    dg = hb * head_dim
    d_model = n_heads * head_dim
    if dg != d_model and dg % 128 != 0:
        hb, dg = n_heads, d_model          # one group spanning all lanes
    return hb, dg


def _choose_tile(seq, target):
    if seq >= target:
        return target
    return max(8, ((seq + 7) // 8) * 8)    # whole (8-padded) sequence as one block


def _const_spec(shape):
    """Full-array weight block, same block for every grid step."""
    return pl.BlockSpec(shape, lambda b, s: (0,) * len(shape))


# ----------------------------------------------------------------------------
# Shared in-kernel compute blocks (operate on already-loaded VMEM tiles).
# ----------------------------------------------------------------------------
def _qkv_compute(src, pos, wqk, bqk, wv, bv, d_model):
    """q = k = src + pos projected with the fused Q|K weight; v from src."""
    x = (src + pos).astype(jnp.bfloat16)
    qk = jnp.dot(x, wqk, preferred_element_type=jnp.float32) + bqk
    v = jnp.dot(src.astype(jnp.bfloat16), wv,
                preferred_element_type=jnp.float32) + bv
    return qk[:, :d_model], qk[:, d_model:], v


def _ffn_ln_compute(attn, src, wo, bo, ln1w, ln1b, w1, b1, w2, b2,
                    ln2w, ln2b, eps):
    o = jnp.dot(attn, wo, preferred_element_type=jnp.float32) + bo
    x1 = src + o
    mu1 = jnp.mean(x1, axis=-1, keepdims=True)
    var1 = jnp.mean((x1 - mu1) ** 2, axis=-1, keepdims=True)
    x1 = (x1 - mu1) * jax.lax.rsqrt(var1 + eps) * ln1w + ln1b

    h = jnp.dot(x1.astype(jnp.bfloat16), w1,
                preferred_element_type=jnp.float32) + b1
    h = jnp.maximum(h, 0.0)
    h2 = jnp.dot(h.astype(jnp.bfloat16), w2,
                 preferred_element_type=jnp.float32) + b2

    x2 = x1 + h2
    mu2 = jnp.mean(x2, axis=-1, keepdims=True)
    var2 = jnp.mean((x2 - mu2) ** 2, axis=-1, keepdims=True)
    return (x2 - mu2) * jax.lax.rsqrt(var2 + eps) * ln2w + ln2b


# ----------------------------------------------------------------------------
# Kernel 1: fused Q|K (+V) projection for the first layer.
# ----------------------------------------------------------------------------
def _qkv_kernel(src_ref, pos_ref, wqk_ref, bqk_ref, wv_ref, bv_ref,
                q_ref, k_ref, v_ref, *, d_model):
    q, k, v = _qkv_compute(src_ref[0], pos_ref[0], wqk_ref[...], bqk_ref[...],
                           wv_ref[...], bv_ref[...], d_model)
    q_ref[0] = q.astype(q_ref.dtype)
    k_ref[0] = k.astype(k_ref.dtype)
    v_ref[0] = v.astype(v_ref.dtype)


def _qkv_projection(src, pos, p, *, ts, vmem_limit):
    B, S, D = src.shape
    act = pl.BlockSpec((1, ts, D), lambda b, s: (b, s, 0))
    return pl.pallas_call(
        functools.partial(_qkv_kernel, d_model=D),
        out_shape=tuple(jax.ShapeDtypeStruct((B, S, D), jnp.bfloat16)
                        for _ in range(3)),
        grid_spec=pltpu.PrefetchScalarGridSpec(
            num_scalar_prefetch=0,
            grid=(B, S // ts),
            in_specs=[act, act,
                      _const_spec((D, 2 * D)), _const_spec((1, 2 * D)),
                      _const_spec((D, D)), _const_spec((1, D))],
            out_specs=[act, act, act]),
        compiler_params=pltpu.CompilerParams(
            dimension_semantics=("parallel", "parallel"),
            vmem_limit_bytes=vmem_limit),
    )(src, pos, p["wqk"], p["bqk"], p["wv"], p["bv"])


# ----------------------------------------------------------------------------
# Kernel 2: head-grouped flash attention (online softmax).
# grid = (B, head_groups, q_blocks, kv_blocks); q/k/v/out stay (B, S, D).
# ----------------------------------------------------------------------------
def _attn_kernel(q_ref, k_ref, v_ref, bias_ref, o_ref, m_sc, l_sc, acc_sc,
                 *, heads_per_group, head_dim):
    ki = pl.program_id(3)

    @pl.when(ki == 0)
    def _():
        m_sc[...] = jnp.full(m_sc.shape, -jnp.inf, jnp.float32)
        l_sc[...] = jnp.zeros(l_sc.shape, jnp.float32)
        acc_sc[...] = jnp.zeros(acc_sc.shape, jnp.float32)

    q = q_ref[0]                       # (tq, Dg) bf16, pre-scaled by 1/sqrt(hd)
    k = k_ref[0]                       # (tk, Dg) bf16
    v = v_ref[0]                       # (tk, Dg) bf16
    bias = bias_ref[0, 0]              # (1, tk) f32 key-padding bias

    for h in range(heads_per_group):   # unrolled; heads share the DMA'd block
        sl = slice(h * head_dim, (h + 1) * head_dim)
        q_h = q[:, sl]
        k_h = k[:, sl]
        v_h = v[:, sl]

        s = jax.lax.dot_general(q_h, k_h, (((1,), (1,)), ((), ())),
                                preferred_element_type=jnp.float32)  # (tq, tk)
        s = s + bias

        m_prev = m_sc[h]                                           # (tq, 1)
        m_new = jnp.maximum(m_prev, jnp.max(s, axis=-1, keepdims=True))
        alpha = jnp.exp(m_prev - m_new)
        p = jnp.exp(s - m_new)

        l_sc[h] = alpha * l_sc[h] + jnp.sum(p, axis=-1, keepdims=True)
        acc_sc[h] = alpha * acc_sc[h] + jnp.dot(
            p.astype(jnp.bfloat16), v_h, preferred_element_type=jnp.float32)
        m_sc[h] = m_new

    @pl.when(ki == pl.num_programs(3) - 1)
    def _():
        outs = []
        for h in range(heads_per_group):
            inv_l = pl.reciprocal(l_sc[h], approx=True)   # EUP slot, near-free
            outs.append(acc_sc[h] * inv_l)                # (tq, hd)
        # lane-dense (tq, Hb*hd) store into the (B, S, D) output block
        o_ref[0] = jnp.concatenate(outs, axis=-1).astype(o_ref.dtype)


def _flash_attention(q, k, v, bias, *, tq, tk, hb, hd, vmem_limit):
    B, S, D = q.shape
    dg = hb * hd
    hg = D // dg
    nkb = S // tk
    bias4 = bias.reshape(B, nkb, 1, tk)        # lane dim == full dim => clean blocks

    q_spec = pl.BlockSpec((1, tq, dg), lambda b, g, qi, ki: (b, qi, g))
    kv_spec = pl.BlockSpec((1, tk, dg), lambda b, g, qi, ki: (b, ki, g))
    bias_spec = pl.BlockSpec((1, 1, 1, tk), lambda b, g, qi, ki: (b, ki, 0, 0))
    out_spec = pl.BlockSpec((1, tq, dg), lambda b, g, qi, ki: (b, qi, g))

    return pl.pallas_call(
        functools.partial(_attn_kernel, heads_per_group=hb, head_dim=hd),
        out_shape=jax.ShapeDtypeStruct((B, S, D), jnp.bfloat16),
        grid_spec=pltpu.PrefetchScalarGridSpec(
            num_scalar_prefetch=0,
            grid=(B, hg, S // tq, nkb),
            in_specs=[q_spec, kv_spec, kv_spec, bias_spec],
            out_specs=out_spec,
            scratch_shapes=[pltpu.VMEM((hb, tq, 1), jnp.float32),
                            pltpu.VMEM((hb, tq, 1), jnp.float32),
                            pltpu.VMEM((hb, tq, hd), jnp.float32)]),
        compiler_params=pltpu.CompilerParams(
            dimension_semantics=("parallel", "parallel", "parallel", "arbitrary"),
            vmem_limit_bytes=vmem_limit),
    )(q, k, v, bias4)


# ----------------------------------------------------------------------------
# Kernel 3: out-proj + residual + LN1 + FFN + residual + LN2
#           (optionally fused with the NEXT layer's Q|K|V projection).
# ----------------------------------------------------------------------------
def _post_kernel(attn_ref, src_ref, wo_ref, bo_ref, ln1w_ref, ln1b_ref,
                 w1_ref, b1_ref, w2_ref, b2_ref, ln2w_ref, ln2b_ref,
                 out_ref, *, eps):
    out = _ffn_ln_compute(attn_ref[0], src_ref[0], wo_ref[...], bo_ref[...],
                          ln1w_ref[...], ln1b_ref[...], w1_ref[...], b1_ref[...],
                          w2_ref[...], b2_ref[...], ln2w_ref[...], ln2b_ref[...],
                          eps)
    out_ref[0] = out.astype(out_ref.dtype)


def _post_qkv_kernel(attn_ref, src_ref, pos_ref,
                     wo_ref, bo_ref, ln1w_ref, ln1b_ref,
                     w1_ref, b1_ref, w2_ref, b2_ref, ln2w_ref, ln2b_ref,
                     nwqk_ref, nbqk_ref, nwv_ref, nbv_ref,
                     out_ref, q_ref, k_ref, v_ref, *, d_model, eps):
    out = _ffn_ln_compute(attn_ref[0], src_ref[0], wo_ref[...], bo_ref[...],
                          ln1w_ref[...], ln1b_ref[...], w1_ref[...], b1_ref[...],
                          w2_ref[...], b2_ref[...], ln2w_ref[...], ln2b_ref[...],
                          eps)
    out_ref[0] = out.astype(out_ref.dtype)
    # Next layer's QKV projection on the tile while it is still in VMEM.
    q, k, v = _qkv_compute(out, pos_ref[0], nwqk_ref[...], nbqk_ref[...],
                           nwv_ref[...], nbv_ref[...], d_model)
    q_ref[0] = q.astype(q_ref.dtype)
    k_ref[0] = k.astype(k_ref.dtype)
    v_ref[0] = v.astype(v_ref.dtype)


def _post_attention(attn, src, p, *, ts, eps, vmem_limit):
    B, S, D = src.shape
    F = p["w1"].shape[1]
    act = pl.BlockSpec((1, ts, D), lambda b, s: (b, s, 0))
    return pl.pallas_call(
        functools.partial(_post_kernel, eps=eps),
        out_shape=jax.ShapeDtypeStruct((B, S, D), jnp.float32),
        grid_spec=pltpu.PrefetchScalarGridSpec(
            num_scalar_prefetch=0,
            grid=(B, S // ts),
            in_specs=[act, act,
                      _const_spec((D, D)), _const_spec((1, D)),
                      _const_spec((1, D)), _const_spec((1, D)),
                      _const_spec((D, F)), _const_spec((1, F)),
                      _const_spec((F, D)), _const_spec((1, D)),
                      _const_spec((1, D)), _const_spec((1, D))],
            out_specs=act),
        compiler_params=pltpu.CompilerParams(
            dimension_semantics=("parallel", "parallel"),
            vmem_limit_bytes=vmem_limit),
    )(attn, src, p["wo"], p["bo"], p["ln1_w"], p["ln1_b"],
      p["w1"], p["b1"], p["w2"], p["b2"], p["ln2_w"], p["ln2_b"])


def _post_attention_qkv(attn, src, pos, p, p_next, *, ts, eps, vmem_limit):
    B, S, D = src.shape
    F = p["w1"].shape[1]
    act = pl.BlockSpec((1, ts, D), lambda b, s: (b, s, 0))
    return pl.pallas_call(
        functools.partial(_post_qkv_kernel, d_model=D, eps=eps),
        out_shape=(jax.ShapeDtypeStruct((B, S, D), jnp.float32),
                   jax.ShapeDtypeStruct((B, S, D), jnp.bfloat16),
                   jax.ShapeDtypeStruct((B, S, D), jnp.bfloat16),
                   jax.ShapeDtypeStruct((B, S, D), jnp.bfloat16)),
        grid_spec=pltpu.PrefetchScalarGridSpec(
            num_scalar_prefetch=0,
            grid=(B, S // ts),
            in_specs=[act, act, act,
                      _const_spec((D, D)), _const_spec((1, D)),
                      _const_spec((1, D)), _const_spec((1, D)),
                      _const_spec((D, F)), _const_spec((1, F)),
                      _const_spec((F, D)), _const_spec((1, D)),
                      _const_spec((1, D)), _const_spec((1, D)),
                      _const_spec((D, 2 * D)), _const_spec((1, 2 * D)),
                      _const_spec((D, D)), _const_spec((1, D))],
            out_specs=[act, act, act, act]),
        compiler_params=pltpu.CompilerParams(
            dimension_semantics=("parallel", "parallel"),
            vmem_limit_bytes=vmem_limit),
    )(attn, src, pos,
      p["wo"], p["bo"], p["ln1_w"], p["ln1_b"],
      p["w1"], p["b1"], p["w2"], p["b2"], p["ln2_w"], p["ln2_b"],
      p_next["wqk"], p_next["bqk"], p_next["wv"], p_next["bv"])


# ----------------------------------------------------------------------------
# Encoder wrapper.
# ----------------------------------------------------------------------------
def transformer_encoder(src_sbd, pos_sbd, key_padding_mask, layer_params, *,
                        nhead, block=256, eps=1e-5):
    """src_sbd, pos_sbd: (S, B, D) (PyTorch convention). Returns (S, B, D)."""
    S0, B, D = src_sbd.shape
    if not layer_params:
        return src_sbd
    hd = D // nhead
    hb, _ = _head_group(nhead, hd)

    src = jnp.transpose(src_sbd, (1, 0, 2))            # (B, S, D)
    pos = jnp.transpose(pos_sbd, (1, 0, 2))

    # Pad S up to a multiple of the tile; padded keys are masked with _NEG_BIAS
    # and padded rows are sliced off at the end (no full-S fallback path).
    ts = _choose_tile(S0, block)
    S = ((S0 + ts - 1) // ts) * ts
    if S != S0:
        src = jnp.pad(src, ((0, 0), (0, S - S0), (0, 0)))
        pos = jnp.pad(pos, ((0, 0), (0, S - S0), (0, 0)))

    if key_padding_mask is None:
        mask = jnp.zeros((B, S0), dtype=bool)
    else:
        mask = key_padding_mask.astype(bool)
    mask = jnp.pad(mask, ((0, 0), (0, S - S0)), constant_values=True)
    bias = jnp.where(mask[:, None, :], _NEG_BIAS, 0.0).astype(jnp.float32)
    # TODO(synk): src_mask (attn_mask) is None in the DETR encoder path; fold it
    # into the bias here if ever needed.

    vmem_limit = _vmem_limit_bytes()
    tq = tk = ts

    n_layers = len(layer_params)
    out = src
    q, k, v = _qkv_projection(src, pos, layer_params[0], ts=ts,
                              vmem_limit=vmem_limit)
    for i, p in enumerate(layer_params):
        attn = _flash_attention(q, k, v, bias, tq=tq, tk=tk, hb=hb, hd=hd,
                                vmem_limit=vmem_limit)
        if i + 1 < n_layers:
            out, q, k, v = _post_attention_qkv(attn, out, pos, p,
                                               layer_params[i + 1], ts=ts,
                                               eps=eps, vmem_limit=vmem_limit)
        else:
            out = _post_attention(attn, out, p, ts=ts, eps=eps,
                                  vmem_limit=vmem_limit)

    # self.norm is None for the default DETR encoder; nothing to do.
    return jnp.transpose(out[:, :S0], (1, 0, 2))


# ----------------------------------------------------------------------------
# Parameter init / preparation.
# ----------------------------------------------------------------------------
def init_layer_params(key, d_model, dim_ff):
    ks = jax.random.split(key, 6)
    scale = 1.0 / math.sqrt(d_model)
    return {
        "wq": jax.random.normal(ks[0], (d_model, d_model), jnp.float32) * scale,
        "wk": jax.random.normal(ks[1], (d_model, d_model), jnp.float32) * scale,
        "wv": jax.random.normal(ks[2], (d_model, d_model), jnp.float32) * scale,
        "wo": jax.random.normal(ks[3], (d_model, d_model), jnp.float32) * scale,
        "bq": jnp.zeros((1, d_model), jnp.float32),
        "bk": jnp.zeros((1, d_model), jnp.float32),
        "bv": jnp.zeros((1, d_model), jnp.float32),
        "bo": jnp.zeros((1, d_model), jnp.float32),
        "ln1_w": jnp.ones((1, d_model), jnp.float32),
        "ln1_b": jnp.zeros((1, d_model), jnp.float32),
        "w1": jax.random.normal(ks[4], (d_model, dim_ff), jnp.float32) * scale,
        "b1": jnp.zeros((1, dim_ff), jnp.float32),
        "w2": jax.random.normal(ks[5], (dim_ff, d_model), jnp.float32)
              * (1.0 / math.sqrt(dim_ff)),
        "b2": jnp.zeros((1, d_model), jnp.float32),
        "ln2_w": jnp.ones((1, d_model), jnp.float32),
        "ln2_b": jnp.zeros((1, d_model), jnp.float32),
    }


def prepare_layer_params(raw, *, nhead):
    """Fold 1/sqrt(head_dim) into Wq/bq, fuse Q|K weights, cast weights to bf16."""
    d_model = raw["wq"].shape[0]
    scale = 1.0 / math.sqrt(d_model // nhead)
    return {
        "wqk": jnp.concatenate([raw["wq"] * scale, raw["wk"]], axis=1).astype(jnp.bfloat16),
        "bqk": jnp.concatenate([raw["bq"] * scale, raw["bk"]], axis=1).astype(jnp.float32),
        "wv": raw["wv"].astype(jnp.bfloat16),
        "bv": raw["bv"].astype(jnp.float32),
        "wo": raw["wo"].astype(jnp.bfloat16),
        "bo": raw["bo"].astype(jnp.float32),
        "ln1_w": raw["ln1_w"].astype(jnp.float32),
        "ln1_b": raw["ln1_b"].astype(jnp.float32),
        "w1": raw["w1"].astype(jnp.bfloat16),
        "b1": raw["b1"].astype(jnp.float32),
        "w2": raw["w2"].astype(jnp.bfloat16),
        "b2": raw["b2"].astype(jnp.float32),
        "ln2_w": raw["ln2_w"].astype(jnp.float32),
        "ln2_b": raw["ln2_b"].astype(jnp.float32),
    }


# ----------------------------------------------------------------------------
# Pure-JAX reference (same bf16-operand / f32-accumulate math) for correctness.
# ----------------------------------------------------------------------------
def _reference(src_sbd, pos_sbd, key_padding_mask, prepared, *, nhead, eps=1e-5):
    S, B, D = src_sbd.shape
    hd = D // nhead
    src = jnp.transpose(src_sbd, (1, 0, 2))
    pos = jnp.transpose(pos_sbd, (1, 0, 2))
    bias = jnp.where(key_padding_mask[:, None, :], _NEG_BIAS, 0.0).astype(jnp.float32)

    def bmm(a, w):  # bf16 operands, f32 accumulation (mirrors the kernels)
        return jnp.einsum("bsk,kf->bsf", a.astype(jnp.bfloat16), w,
                          preferred_element_type=jnp.float32)

    def ln(x, w, b):
        mu = jnp.mean(x, -1, keepdims=True)
        var = jnp.mean((x - mu) ** 2, -1, keepdims=True)
        return (x - mu) * jax.lax.rsqrt(var + eps) * w + b

    out = src
    for p in prepared:
        x = out + pos
        qk = bmm(x, p["wqk"]) + p["bqk"]
        q = qk[..., :D].astype(jnp.bfloat16).reshape(B, S, nhead, hd)
        k = qk[..., D:].astype(jnp.bfloat16).reshape(B, S, nhead, hd)
        v = (bmm(out, p["wv"]) + p["bv"]).astype(jnp.bfloat16).reshape(B, S, nhead, hd)
        s = jnp.einsum("bqhd,bkhd->bhqk", q, k, preferred_element_type=jnp.float32)
        s = s + bias[:, :, None, :]
        a = jax.nn.softmax(s, axis=-1)
        o = jnp.einsum("bhqk,bkhd->bqhd", a.astype(jnp.bfloat16), v,
                       preferred_element_type=jnp.float32).reshape(B, S, D)
        o = bmm(o.astype(jnp.bfloat16), p["wo"]) + p["bo"]
        x1 = ln(out + o, p["ln1_w"], p["ln1_b"])
        h = jnp.maximum(bmm(x1, p["w1"]) + p["b1"], 0.0)
        h2 = bmm(h, p["w2"]) + p["b2"]
        out = ln(x1 + h2, p["ln2_w"], p["ln2_b"])
    return jnp.transpose(out, (1, 0, 2))


if __name__ == "__main__":
    # Small shapes: seq=16, batch=2, d_model=32, nhead=4, ffn=64, num_layers=2.
    # block=8 so the attention online-softmax streams over 2 kv blocks and the
    # token kernels run a multi-step pipelined grid.
    S, B, D, H, F, L = 16, 2, 32, 4, 64, 2

    key = jax.random.PRNGKey(0)
    k_src, k_pos, *k_layers = jax.random.split(key, 2 + L)

    src = jax.random.normal(k_src, (S, B, D), jnp.float32)           # (S, B, D)
    pos = jax.random.normal(k_pos, (S, B, D), jnp.float32)           # (S, B, D)
    key_padding_mask = jnp.zeros((B, S), dtype=bool).at[1, -2:].set(True)
    layer_params = [prepare_layer_params(init_layer_params(k, D, F), nhead=H)
                    for k in k_layers]

    out = transformer_encoder(src, pos, key_padding_mask, layer_params,
                              nhead=H, block=8)
    out = jax.block_until_ready(out)

    ref = _reference(src, pos, key_padding_mask, layer_params, nhead=H)
    assert out.shape == (S, B, D)
    err = float(jnp.max(jnp.abs(out - ref)))
    assert err < 3e-2, f"Pallas output mismatch vs JAX reference: {err}"

    print("KERNEL_OK")
</pallas_src>

<mosaic_0001>
module attributes {stable_mosaic.version = 11 : i64} {
  func.func @_qkv_kernel(%arg0: i32, %arg1: i32, %arg2: memref<1x8x32xf32, #tpu.memory_space<vmem>>, %arg3: memref<1x8x32xf32, #tpu.memory_space<vmem>>, %arg4: memref<32x64xbf16, #tpu.memory_space<vmem>>, %arg5: memref<1x64xf32, #tpu.memory_space<vmem>>, %arg6: memref<32x32xbf16, #tpu.memory_space<vmem>>, %arg7: memref<1x32xf32, #tpu.memory_space<vmem>>, %arg8: memref<1x8x32xbf16, #tpu.memory_space<vmem>>, %arg9: memref<1x8x32xbf16, #tpu.memory_space<vmem>>, %arg10: memref<1x8x32xbf16, #tpu.memory_space<vmem>>) attributes {dimension_semantics = [#tpu.dimension_semantics<parallel>, #tpu.dimension_semantics<parallel>], iteration_bounds = array<i64: 2, 2>, scalar_prefetch = 0 : i64, scratch_operands = 0 : i64, tpu.core_type = #tpu.core_type<tc>, window_params = [{transform_indices = @transform_0, window_bounds = array<i64: 1, 8, 32>}, {transform_indices = @transform_1, window_bounds = array<i64: 1, 8, 32>}, {pipeline_mode = #tpu.pipeline_mode<synchronous>, transform_indices = @transform_2, window_bounds = array<i64: 32, 64>}, {pipeline_mode = #tpu.pipeline_mode<synchronous>, transform_indices = @transform_3, window_bounds = array<i64: 1, 64>}, {pipeline_mode = #tpu.pipeline_mode<synchronous>, transform_indices = @transform_4, window_bounds = array<i64: 32, 32>}, {pipeline_mode = #tpu.pipeline_mode<synchronous>, transform_indices = @transform_5, window_bounds = array<i64: 1, 32>}, {transform_indices = @transform_6, window_bounds = array<i64: 1, 8, 32>}, {transform_indices = @transform_7, window_bounds = array<i64: 1, 8, 32>}, {transform_indices = @transform_8, window_bounds = array<i64: 1, 8, 32>}]} {
    %c0 = arith.constant 0 : index
    %c0_0 = arith.constant 0 : index
    %c0_1 = arith.constant 0 : index
    %0 = vector.load %arg2[%c0, %c0_0, %c0_1] : memref<1x8x32xf32, #tpu.memory_space<vmem>>, vector<1x8x32xf32>
    %1 = vector.shape_cast %0 : vector<1x8x32xf32> to vector<8x32xf32>
    %c0_2 = arith.constant 0 : index
    %c0_3 = arith.constant 0 : index
    %c0_4 = arith.constant 0 : index
    %2 = vector.load %arg3[%c0_2, %c0_3, %c0_4] : memref<1x8x32xf32, #tpu.memory_space<vmem>>, vector<1x8x32xf32>
    %3 = vector.shape_cast %2 : vector<1x8x32xf32> to vector<8x32xf32>
    %c0_5 = arith.constant 0 : index
    %c0_6 = arith.constant 0 : index
    %4 = vector.load %arg4[%c0_5, %c0_6] : memref<32x64xbf16, #tpu.memory_space<vmem>>, vector<32x64xbf16>
    %c0_7 = arith.constant 0 : index
    %c0_8 = arith.constant 0 : index
    %5 = vector.load %arg5[%c0_7, %c0_8] : memref<1x64xf32, #tpu.memory_space<vmem>>, vector<1x64xf32>
    %c0_9 = arith.constant 0 : index
    %c0_10 = arith.constant 0 : index
    %6 = vector.load %arg6[%c0_9, %c0_10] : memref<32x32xbf16, #tpu.memory_space<vmem>>, vector<32x32xbf16>
    %c0_11 = arith.constant 0 : index
    %c0_12 = arith.constant 0 : index
    %7 = vector.load %arg7[%c0_11, %c0_12] : memref<1x32xf32, #tpu.memory_space<vmem>>, vector<1x32xf32>
    %8 = arith.addf %1, %3 : vector<8x32xf32>
    %9 = arith.truncf %8 : vector<8x32xf32> to vector<8x32xbf16>
    %cst = arith.constant dense<0.000000e+00> : vector<8x64xf32>
    %10 = tpu.matmul %9, %4, %cst {dimension_numbers = #tpu.dot_dimension_numbers<[1], [0], [0], [1], [0, 0, 1, 1], [], []>} : vector<8x32xbf16>, vector<32x64xbf16>, vector<8x64xf32> -> vector<8x64xf32>
    %11 = vector.broadcast %5 : vector<1x64xf32> to vector<8x64xf32>
    %12 = arith.addf %10, %11 : vector<8x64xf32>
    %13 = arith.truncf %1 : vector<8x32xf32> to vector<8x32xbf16>
    %cst_13 = arith.constant dense<0.000000e+00> : vector<8x32xf32>
    %14 = tpu.matmul %13, %6, %cst_13 {dimension_numbers = #tpu.dot_dimension_numbers<[1], [0], [0], [1], [0, 0, 1, 1], [], []>} : vector<8x32xbf16>, vector<32x32xbf16>, vector<8x32xf32> -> vector<8x32xf32>
    %15 = vector.broadcast %7 : vector<1x32xf32> to vector<8x32xf32>
    %16 = arith.addf %14, %15 : vector<8x32xf32>
    %17 = vector.extract_strided_slice %12 {offsets = [0, 0], sizes = [8, 32], strides = [1, 1]} : vector<8x64xf32> to vector<8x32xf32>
    %18 = vector.extract_strided_slice %12 {offsets = [0, 32], sizes = [8, 32], strides = [1, 1]} : vector<8x64xf32> to vector<8x32xf32>
    %19 = arith.truncf %17 : vector<8x32xf32> to vector<8x32xbf16>
    %c0_14 = arith.constant 0 : index
    %c0_15 = arith.constant 0 : index
    %c0_16 = arith.constant 0 : index
    %20 = vector.load %arg8[%c0_14, %c0_15, %c0_16] : memref<1x8x32xbf16, #tpu.memory_space<vmem>>, vector<1x8x32xbf16>
    %21 = vector.shape_cast %20 : vector<1x8x32xbf16> to vector<8x32xbf16>
    %22 = vector.shape_cast %19 : vector<8x32xbf16> to vector<1x8x32xbf16>
    tpu.vector_store %arg8[%c0_14, %c0_15, %c0_16], %22 {strides = array<i32>} : memref<1x8x32xbf16, #tpu.memory_space<vmem>>, vector<1x8x32xbf16>,
    %23 = arith.truncf %18 : vector<8x32xf32> to vector<8x32xbf16>
    %c0_17 = arith.constant 0 : index
    %c0_18 = arith.constant 0 : index
    %c0_19 = arith.constant 0 : index
    %24 = vector.load %arg9[%c0_17, %c0_18, %c0_19] : memref<1x8x32xbf16, #tpu.memory_space<vmem>>, vector<1x8x32xbf16>
    %25 = vector.shape_cast %24 : vector<1x8x32xbf16> to vector<8x32xbf16>
    %26 = vector.shape_cast %23 : vector<8x32xbf16> to vector<1x8x32xbf16>
    tpu.vector_store %arg9[%c0_17, %c0_18, %c0_19], %26 {strides = array<i32>} : memref<1x8x32xbf16, #tpu.memory_space<vmem>>, vector<1x8x32xbf16>,
    %27 = arith.truncf %16 : vector<8x32xf32> to vector<8x32xbf16>
    %c0_20 = arith.constant 0 : index
    %c0_21 = arith.constant 0 : index
    %c0_22 = arith.constant 0 : index
    %28 = vector.load %arg10[%c0_20, %c0_21, %c0_22] : memref<1x8x32xbf16, #tpu.memory_space<vmem>>, vector<1x8x32xbf16>
    %29 = vector.shape_cast %28 : vector<1x8x32xbf16> to vector<8x32xbf16>
    %30 = vector.shape_cast %27 : vector<8x32xbf16> to vector<1x8x32xbf16>
    tpu.vector_store %arg10[%c0_20, %c0_21, %c0_22], %30 {strides = array<i32>} : memref<1x8x32xbf16, #tpu.memory_space<vmem>>, vector<1x8x32xbf16>,
    return
  }
  func.func @transform_0(%arg0: i32, %arg1: i32) -> (i32, i32, i32) {
    %c0_i32 = arith.constant 0 : i32
    %c0_i32_0 = arith.constant 0 : i32
    return %arg0, %arg1, %c0_i32 : i32, i32, i32
  }
  func.func @transform_1(%arg0: i32, %arg1: i32) -> (i32, i32, i32) {
    %c0_i32 = arith.constant 0 : i32
    %c0_i32_0 = arith.constant 0 : i32
    return %arg0, %arg1, %c0_i32 : i32, i32, i32
  }
  func.func @transform_2(%arg0: i32, %arg1: i32) -> (i32, i32) {
    %c0_i32 = arith.constant 0 : i32
    %c0_i32_0 = arith.constant 0 : i32
    %c0_i32_1 = arith.constant 0 : i32
    return %c0_i32, %c0_i32_0 : i32, i32
  }
  func.func @transform_3(%arg0: i32, %arg1: i32) -> (i32, i32) {
    %c0_i32 = arith.constant 0 : i32
    %c0_i32_0 = arith.constant 0 : i32
    %c0_i32_1 = arith.constant 0 : i32
    return %c0_i32, %c0_i32_0 : i32, i32
  }
  func.func @transform_4(%arg0: i32, %arg1: i32) -> (i32, i32) {
    %c0_i32 = arith.constant 0 : i32
    %c0_i32_0 = arith.constant 0 : i32
    %c0_i32_1 = arith.constant 0 : i32
    return %c0_i32, %c0_i32_0 : i32, i32
  }
  func.func @transform_5(%arg0: i32, %arg1: i32) -> (i32, i32) {
    %c0_i32 = arith.constant 0 : i32
    %c0_i32_0 = arith.constant 0 : i32
    %c0_i32_1 = arith.constant 0 : i32
    return %c0_i32, %c0_i32_0 : i32, i32
  }
  func.func @transform_6(%arg0: i32, %arg1: i32) -> (i32, i32, i32) {
    %c0_i32 = arith.constant 0 : i32
    %c0_i32_0 = arith.constant 0 : i32
    return %arg0, %arg1, %c0_i32 : i32, i32, i32
  }
  func.func @transform_7(%arg0: i32, %arg1: i32) -> (i32, i32, i32) {
    %c0_i32 = arith.constant 0 : i32
    %c0_i32_0 = arith.constant 0 : i32
    return %arg0, %arg1, %c0_i32 : i32, i32, i32
  }
  func.func @transform_8(%arg0: i32, %arg1: i32) -> (i32, i32, i32) {
    %c0_i32 = arith.constant 0 : i32
    %c0_i32_0 = arith.constant 0 : i32
    return %arg0, %arg1, %c0_i32 : i32, i32, i32
  }
}

</mosaic_0001>

<bundles_post_ra>
// kernel: tpu_custom_call.1
= control target key start
LH: loop header
LB: loop body
LE: loop exit
PB: predicated region body
PF: predicated region fallthrough
CT: control target
= control target key end

     0   :  { %s1673_s0 = inlined_call_operand.hbm [shape: f32[2,16,32], index: 0, kind: input, shape index: {}]   ;;  %s1674_s1 = inlined_call_operand.hbm [shape: f32[2,16,32], index: 1, kind: input, shape index: {}]   ;;  %s1675_s2 = inlined_call_operand.hbm [shape: bf16[32,64], index: 2, kind: input, shape index: {}]   ;;  %s1676_s3 = inlined_call_operand.vmem [shape: f32[1,64], index: 3, kind: input, shape index: {}]   ;;  %s1677_s4 = inlined_call_operand.hbm [shape: bf16[32,32], index: 4, kind: input, shape index: {}]   ;;  %s1678_s5 = inlined_call_operand.vmem [shape: f32[1,32], index: 5, kind: input, shape index: {}]   ;;  %s1679_s6 = inlined_call_operand.hbm [shape: bf16[2,16,32], index: 6, kind: output, shape index: {0}]   ;;  %s1680_s7 = inlined_call_operand.hbm [shape: bf16[2,16,32], index: 7, kind: output, shape index: {1}]   ;;  %s1681_s8 = inlined_call_operand.hbm [shape: bf16[2,16,32], index: 8, kind: output, shape index: {2}]  }
   0x1   :  { %1692 = sst [smem:[#allocation24_spill]] %s1675_s2 }
   0x2   :  { %1693 = sst [smem:[#allocation25_spill]] %s1677_s4 }
   0x3   :  { %1694 = sst [smem:[#allocation26_spill]] %s1678_s5 }
   0x4   :  { %1695 = sst [smem:[#allocation27_spill]] %s1679_s6 }
   0x5   :  { %1696 = sst [smem:[#allocation28_spill]] %s1680_s7 }
   0x6   :  { %1697 = sst [smem:[#allocation29_spill]] %s1681_s8 }
   0x7   :  { %14 = vsyncpa [#allocation3], 0 }
   0x8   :  { %16 = vsyncpa [#allocation3 + $0x1], 0 }
   0x9   :  { %17 = vsyncpa [#allocation6], 0 }
   0xa   :  { %19 = vsyncpa [#allocation6 + $0x1], 0 }
   0xb   :  { %20 = vsyncpa [#allocation9], 0 }
   0xc   :  { %21 = vsyncpa [#allocation4], 0 }
   0xd   :  { %23 = vsyncpa [#allocation4 + $0x1], 0 }
   0xe   :  { %24 = vsyncpa [#allocation12], 0 }
   0xf   :  { %26 = vsyncpa [#allocation12 + $0x1], 0  ;;  %s1349_s27 = smov 0   ;;  %s1351_s28 = smov 0  }
  0x10   :  { %s1353_s29 = smov 0   ;;  %s1355_s30 = smov 0  }
  0x11   :  { %s1357_s9 = smov 0   ;;  %s1359_s10 = smov 0  }
  0x12   :  { %s1361_s11 = smov 0   ;;  %s1363_s12 = smov 0  }
  0x13 LB: > { %1698 = sst [smem:[#allocation20_spill]] %s1262_s27  ;;  %s1390_s13 = sadd.s32 4294967295, %s1290_s12   ;;  %s1290_s12 = sphi %s1363_s12, %s32_s12   ;;  %s1286_s11 = sphi %s1361_s11, %s1732_s11   ;;  %s1282_s10 = sphi %s1359_s10, %s1731_s10   ;;  %s1278_s9 = sphi %s1357_s9, %s1730_s9   ;;  %s1274_s30 = sphi %s1355_s30, %s1729_s30   ;;  %s1270_s29 = sphi %s1353_s29, %s1728_s29   ;;  %s1266_s28 = sphi %s1351_s28, %s1727_s28   ;;  %s1262_s27 = sphi %s1349_s27, %s1726_s27  }
  0x14   : > { %s1683_s14 = sadd.s32 4294967294, %s1290_s12   ;;  %p66_p0 = scmp.ne.s32.totalorder %s1266_s28, %s1262_s27 }
  0x15   : > { %p1682_p1 = scmp.eq.s32.totalorder %s1390_s13, 0  ;;  %p210_p3 = scmp.eq.s32.totalorder %s1683_s14, 3 }
  0x16   : > { %p834_p5 = scmp.ge.s32.totalorder %s1290_s12, 1  ;;  %p273_p7 = scmp.lt.s32.totalorder %s1290_s12, 5 }
  0x17   : > { %p1401_p4 = por %p1682_p1, %p66_p0  ;;  %p1406_p6 = por %p210_p3, %p66_p0 }
  0x18   : > { %p1411_p8 = pnand %p834_p5, %p273_p7  ;;  %s1292_s18 = smov [#allocation7]  }
  0x19   : > { %s1700_s16 = scalar_select %p1406_p6, 1, 0 }
  0x1a   : > { %s285_s19 = sshll.u32 %s1292_s18, 4  ;;  %p913_p9 = pneg %p1411_p8  ;;  %s286_s19 = int_to_ptr.vmem [resolvable:$true] %s285_s19 }
  0x1b   : > { %1701 = sst [smem:[#allocation21_spill]] %s1700_s16  ;;  %s1293_s21 = smov [#allocation8]  }
  0x1c   : > { %p1419_p10 = pnand %p913_p9, %p1682_p1  ;;  %s301_s22 = sshll.u32 %s1293_s21, 4  ;;  %s302_s22 = int_to_ptr.vmem [resolvable:$true] %s301_s22 }
  0x1d   : > { %s1029_s23 = scalar_lea.vmem %s286_s19, 256  ;;  %p1037_p3 = scmp.lt.s32.totalorder %s286_s19, %s286_s19 }
  0x1e   : > { %p1020_p11 = pneg %p1419_p10  ;;  %p1030_p12 = scmp.ne.s32.totalorder %s286_s19, %s1029_s23 }
  0x1f   : > { %p1038_p5 = scmp.lt.s32.totalorder %s1029_s23, %s1029_s23 }
  0x20   : > { %p1032_p13 = pnand %p1030_p12, %p1020_p11 }
  0x21   : > { %p1039_p7 = por %p1038_p5, %p1037_p3 }
  0x22   : > { %p1033_p0 = pneg %p1032_p13 }
  0x24   : > { %p1040_p9 = pnand %p1039_p7, %p1033_p0 }
  0x26   : > { %1043 = shalt.err (!%p1040_p9)
}
  0x27   : > { %s1294_s24 = smov 64   ;;  %s1295_s25 = smov 4  }
  0x28   : > { %s1704_s2 = sld [smem:[#allocation24_spill]]  ;;  %s1055_s21 = scalar_lea.vmem %s302_s22, 256 }
  0x29   : > { %p1056_p1 = scmp.ne.s32.totalorder %s302_s22, %s1055_s21  ;;  %p1063_p2 = scmp.lt.s32.totalorder %s302_s22, %s302_s22 }
  0x2a   : > { %p1064_p6 = scmp.lt.s32.totalorder %s1055_s21, %s1055_s21 }
  0x2b   : > { %p1058_p12 = pnand %p1056_p1, %p1020_p11 }
  0x2c   : > { %p1065_p3 = por %p1064_p6, %p1063_p2 }
  0x2d   : > { %p1059_p13 = pneg %p1058_p12 }
  0x2e   : > { %916 = dma.hbm_to_vmem [thread:$0]  (!%p1419_p10), %s1704_s2, 256, %s286_s19, [#allocation6], %s1294_s24, %s1294_s24, %s1295_s25  }
  0x2f   : > { %p1066_p0 = pnand %p1065_p3, %p1059_p13 }
  0x31   : > { %1069 = shalt.err (!%p1066_p0)
}
  0x32   : > { %s1705_s4 = sld [smem:[#allocation25_spill]]  ;;  %s41_s19 = sadd.s32 1, %s1282_s10 }
  0x33   : > { %s44_s26 = sadd.s32 1, %s1286_s11  ;;  %p42_p1 = scmp.ge.s32.totalorder %s41_s19, 2 }
  0x34   : > { %s53_s20 = sadd.s32 1, %s1270_s29  ;;  %p60_p2 = scmp.ne.s32.totalorder %s1270_s29, %s1266_s28 }
  0x35   : > { %p61_p6 = scmp.eq.s32.totalorder %s1290_s12, 0  ;;  %s1734_s19 = smov (%p42_p1, %s41_s19), 0 }
  0x36   : > { %1706 = sst [smem:[#allocation22_spill]] %s1734_s19  ;;  %s1736_s26 = smov (!%p42_p1, %s44_s26), %s1286_s11 }
  0x37   : > { %s49_s14 = ssub.s32 %s1282_s10, %s1734_s19  ;;  %p1452_p11 = por %p61_p6, %p60_p2 }
  0x38   : > { %919 = dma.hbm_to_vmem [thread:$0]  (!%p1419_p10), %s1705_s4, 256, %s302_s22, [#allocation9], %s1294_s24, %s1294_s24, %s1295_s25  }
  0x39   : > { %p46_p10 = scmp.ge.s32.totalorder %s1736_s26, 2  ;;  %p1708_p5 = scmp.eq.s32.totalorder %s1390_s13, 3 }
  0x3a   : > { %p939_p9 = scmp.lt.s32.totalorder %s1290_s12, 4  ;;  %s318_s24 = sand.u32 1, %s1270_s29  }
  0x3b   : > { %p1458_p7 = por %p1708_p5, %p60_p2  ;;  %s1738_s26 = smov (%p46_p10, %s1736_s26), 0 }
  0x3c   : > { %s1466_s25 = sshll.u32 %s318_s24, 3  ;;  %s48_s21 = ssub.s32 %s1286_s11, %s1738_s26 }
  0x3d   : > { %s1709_s22 = scalar_select %p1458_p7, 1, 0 }
  0x3e   : > { %s50_s23 = sor.u32 %s49_s14, %s48_s21  ;;  %s839_s2 = sshll.u32 %s1286_s11, 1 }
  0x3f   : > { %1710 = sst [smem:[#allocation23_spill]] %s1709_s22  ;;  %p51_p12 = scmp.eq.s32.totalorder %s50_s23, 0 }
  0x40   : > { %s327_s4 = sadd.s32 %s1282_s10, %s839_s2  ;;  %s322_s16 = scalar_lea.vmem [#allocation2], %s1466_s25 }
  0x41   : > { %s840_s19 = sshll.u32 %s327_s4, 7  ;;  %s331_s27 = sshll.u32 %s322_s16, 4  ;;  %s332_s27 = int_to_ptr.vmem [resolvable:$true] %s331_s27 }
  0x42   : > { %s1474_s8 = scalar_select %p51_p12, %s1270_s29, %s53_s20  }
  0x43   : > { %s329_s22 = scalar_lea.hbm %s1673_s0, %s840_s19  ;;  %p1483_p13 = pnand %p939_p9, %p1452_p11 }
  0x44   : > { %s1490_s2 = scalar_lea.hbm %s1674_s1, %s840_s19  ;;  %s338_s4 = sand.u32 1, %s1290_s12  }
  0x45   : > { %s319_s16 = scalar_lea.sflag [#allocation3], %s318_s24  ;;  %p1072_p3 = pneg %p1483_p13 }
  0x46   : > { %s1083_s6 = scalar_lea.vmem %s332_s27, 128  ;;  %s1296_s7 = smov [#allocation2]  }
  0x47   : > { %p1084_p0 = scmp.ne.s32.totalorder %s332_s27, %s1083_s6  ;;  %s1088_s20 = sshll.u32 %s1296_s7, 4  ;;  %s1089_s20 = int_to_ptr.vmem [resolvable:$false] %s1088_s20 }
  0x48   : > { %s1090_s18 = scalar_lea.vmem %s1089_s20, 256  ;;  %p1091_p6 = scmp.lt.s32.totalorder %s332_s27, %s1089_s20 }
  0x49   : > { %p1086_p1 = pnand %p1084_p0, %p1072_p3  ;;  %p1092_p11 = scmp.lt.s32.totalorder %s1090_s18, %s1083_s6 }
  0x4b   : > { %p1087_p2 = pneg %p1086_p1  ;;  %p1093_p10 = por %p1092_p11, %p1091_p6 }
  0x4d   : > { %p1094_p5 = pnand %p1093_p10, %p1087_p2 }
  0x4f   : > { %1097 = shalt.err (!%p1094_p5)
}
  0x50   : > { %923 = dma.hbm_to_vmem [thread:$0]  (!%p1483_p13), %s329_s22, 128, %s332_s27, %s319_s16  }
  0x51   : > { %s342_s19 = scalar_lea.vmem [#allocation5], %s1466_s25  ;;  %s339_s23 = scalar_lea.sflag [#allocation6], %s338_s4 }
  0x52   : > { %s351_s24 = sshll.u32 %s342_s19, 4  ;;  %s1297_s21 = smov [#allocation5]   ;;  %s352_s24 = int_to_ptr.vmem [resolvable:$true] %s351_s24 }
  0x53   : > { %s1111_s14 = scalar_lea.vmem %s352_s24, 128  ;;  %s1116_s6 = sshll.u32 %s1297_s21, 4  ;;  %s1117_s6 = int_to_ptr.vmem [resolvable:$false] %s1116_s6 }
  0x54   : > { %p1112_p9 = scmp.ne.s32.totalorder %s352_s24, %s1111_s14  ;;  %s1118_s7 = scalar_lea.vmem %s1117_s6, 256 }
  0x55   : > { %p1119_p1 = scmp.lt.s32.totalorder %s352_s24, %s1117_s6  ;;  %p1120_p2 = scmp.lt.s32.totalorder %s1118_s7, %s1111_s14 }
  0x56   : > { %p1114_p12 = pnand %p1112_p9, %p1072_p3 }
  0x57   : > { %p1121_p6 = por %p1120_p2, %p1119_p1 }
  0x58   : > { %p1115_p0 = pneg %p1114_p12 }
  0x5a   : > { %p1122_p11 = pnand %p1121_p6, %p1115_p0 }
  0x5c   : > { %1125 = shalt.err (!%p1122_p11)
}
  0x5d   : > { %926 = dma.hbm_to_vmem [thread:$0]  (!%p1483_p13), %s1490_s2, 128, %s352_s24, %s339_s23  }
  0x5e   : > { %360 = sbr.rel (%p1411_p8) target bundleno = 465 (0x1d1), region = 44  ;;  %s1510_s27 = sand.u32 (!%p1411_p8), 1, %s1266_s28  }
  0x5f   : > { %s845_s22 = sshll.u32 (!%p1411_p8), %s1510_s27, 3  ;;  %s363_s25 = scalar_lea.sflag (!%p1411_p8), [#allocation3], %s1510_s27 }
  0x60   : > { %s366_s4 = scalar_lea.vmem (!%p1411_p8), [#allocation2], %s845_s22 }
  0x63   : > { %1237 = dma.done.wait (%p1401_p4), %s363_s25, 128  }
  0x64   : > { %1239 = vsyncadd (%p1401_p4), %s363_s25, 4294967168  ;;  %s371_s5 = sand.u32 1, %s1390_s13   ;;  %s375_s2 = scalar_lea.vmem [#allocation5], %s845_s22 }
  0x65   : > { %s372_s17 = scalar_lea.sflag [#allocation6], %s371_s5 }
  0x66   : > { %1241 = dma.done.wait (%p1401_p4), %s372_s17, 128  }
  0x67   : > { %1243 = vsyncadd (%p1401_p4), %s372_s17, 4294967168  ;;  %p1712_p8 = scmp.eq.s32.totalorder %s1390_s13, 0 }
  0x69   : > { %1245 = dma.done.wait (%p1712_p8), [#allocation6], 256   ;;  %p1713_p13 = pmov %p1712_p8 }
  0x6a   : > { %p1714_p3 = pmov %p1712_p8 }
  0x6b   : > { %1247 = vsyncadd (%p1713_p13), [#allocation6], 4294967040 }
  0x6c   : > { %1249 = dma.done.wait (%p1714_p3), [#allocation9], 256   ;;  %p1715_p10 = pmov %p1714_p3 }
  0x6d   : > { %v1298_v0 = vmov 0.0   ;;  %vm1299_vm0 = vmmov 0   ;;  %v1014_v1 = vld [vmem:[#allocation7 + $0x8] sm:$0xff]   ;;  %v1015_v2 = vld [vmem:[#allocation7] sm:$0xff]   ;;  %v433_v4 = vld [vmem:[%s375_s2] sm:$0xff]  ;;  %vm464_vm1 = vcmask 261120  }
  0x6e   : > { %1251 = vsyncadd (%p1715_p10), [#allocation9], 4294967040  ;;  %879 = vmatprep.subr.bf16.mxu0 %v1298_v0  ;;  %883 = vmatprep.mubr.msk.bf16.mxu0 %vm1299_vm0, %v1298_v0  ;;  %v432_v3 = vld [vmem:[%s366_s4] sm:$0xff]  ;;  %v1016_v6 = vld [vmem:[#allocation8 + $0x8] sm:$0xff]   ;;  %s864_s15 = sshll.u32 %s1278_s9, 1  ;;  %s1535_s16 = sshll.u32 %s1510_s27, 2 }
  0x6f   : > { %887 = vmatprep.subr.bf16.mxu1 %v1298_v0  ;;  %891 = vmatprep.mubr.msk.bf16.mxu1 %vm1299_vm0, %v1298_v0  ;;  %v444_v5 = vadd.f32 %v433_v4, %v432_v3  ;;  %v1017_v8 = vld [vmem:[#allocation8] sm:$0xff]   ;;  %v508_v9 = vpack.c.bf16 %v432_v3, %v432_v3  ;;  %s604_s20 = sadd.s32 %s1274_s30, %s864_s15  ;;  %v852_v10 = vld [vmem:[%s1676_s3] ss:$0 sm:$0xff]  ;;  %s416_s23 = scalar_lea.vmem [#allocation10], %s1535_s16  ;;  %vm571_vm2 = vcmask 257024  }
  0x70   : > { %880 = vmatpush3.bf16.msra.mxu0 %v1014_v1  ;;  %888 = vmatpush3.bf16.msra.mxu1 %v1016_v6  ;;  %s1541_s24 = sshll.u32 %s604_s20, 6  ;;  %s608_s14 = sshll.u32 %s416_s23, 4  ;;  %s1553_s14 = int_to_ptr.vmem [resolvable:$true] %s608_s14 }
  0x71   : > { %881 = vmatprep.subr.bf16.mxu0 %v1298_v0  ;;  %v445_v7 = vpack.c.bf16 %v444_v5, %v444_v5  ;;  %889 = vmatprep.subr.bf16.mxu1 %v1298_v0  ;;  %s1716_s7 = sld [smem:[#allocation26_spill]]  ;;  %s1300_s17 = smov 96  }
  0x72   : > { %s1718_s25 = sld [smem:[#allocation27_spill]]  ;;  %s583_s2 = scalar_lea.sflag [#allocation4], %s1510_s27 }
  0x73   : > { %s1126_s15 = scalar_lea.vmem %s1553_s14, 64  ;;  %s1301_s20 = smov [#allocation10]  }
  0x74   : > { %882 = vmatpush3.bf16.msra.mxu0 %v1015_v2  ;;  %890 = vmatpush3.bf16.msra.mxu1 %v1017_v8  ;;  %p1127_p4 = scmp.ne.s32.totalorder %s1553_s14, %s1126_s15  ;;  %s1130_s18 = sshll.u32 %s1301_s20, 4  ;;  %s1131_s18 = int_to_ptr.vmem [resolvable:$false] %s1130_s18 }
  0x75   : > { %s1132_s19 = scalar_lea.vmem %s1131_s18, 128  ;;  %p1133_p12 = scmp.lt.s32.totalorder %s1553_s14, %s1131_s18 }
  0x76   : > { %p1128_p5 = pnand %p1127_p4, %p1458_p7  ;;  %p1134_p0 = scmp.lt.s32.totalorder %s1132_s19, %s1126_s15 }
  0x77   : > { %884 = vmatmul.mubr.msk.bf16.vlgmr.msra.gmra.mxu0 %vm464_vm1, %v445_v7  ;;  %892 = vmatmul.mubr.msk.bf16.vlgmr.msra.gmra.mxu1 %vm464_vm1, %v508_v9  ;;  %v856_v13 = vld [vmem:[%s1716_s7] ss:$0 sm:$0xff] }
  0x78   : > { %s1551_s4 = scalar_lea.hbm %s1718_s25, %s1541_s24  ;;  %p1129_p9 = pneg %p1128_p5 }
  0x79   : > { %p1135_p1 = por %p1134_p0, %p1133_p12 }
  0x7b   : > { %p1136_p2 = pnand %p1135_p1, %p1129_p9 }
 0x137   : > { %v502_v11 = vpop.f32.mrf.mxu0  ;;  %v564_v16 = vpop.f32.mrf.mxu1 }
 0x138   : > { %v503_v12 = vadd.f32 %v852_v10, %v502_v11  ;;  %v565_v18 = vadd.f32 %v856_v13, %v564_v16 }
 0x139   : > { %v885_v14 = vpop.f32.mrf.mxu0  ;;  %v893_v19 = vpop.f32.mrf.mxu1 }
 0x13a   : > { %v570_v15 = vpack.c.bf16 %v503_v12, %v503_v12  ;;  %v580_v21 = vpack.c.bf16 %v565_v18, %v565_v18 }
 0x13b   : > { %v505_v17 = vpop.f32.mrf.mxu0 }
 0x13c   : > { %576 = vrot.lane.b32.xlu0 %v570_v15, %s1300_s17  ;;  %572 = vst.msk [vmem:[%s416_s23] sm:$0xf] %vm571_vm2, %v570_v15 }
 0x13d   : > { %v886_v20 = vpop.f32.mrf.mxu0 }
 0x13e   : > { %1139 = shalt.err (!%p1136_p2)
}
 0x13f   : > { %s1140_s23 = scalar_lea.hbm %s1551_s4, 64  ;;  %s1144_s6 = scalar_lea.hbm %s1718_s25, 256 }
 0x140   : > { %p1141_p6 = scmp.ne.s32.totalorder %s1551_s4, %s1140_s23  ;;  %p1145_p13 = scmp.lt.s32.totalorder %s1551_s4, %s1718_s25 }
 0x141   : > { %p1146_p3 = scmp.lt.s32.totalorder %s1144_s6, %s1140_s23 }
 0x142   : > { %p1142_p11 = pnand %p1141_p6, %p1458_p7 }
 0x143   : > { %p1147_p10 = por %p1146_p3, %p1145_p13 }
 0x144   : > { %p1143_p8 = pneg %p1142_p11 }
 0x146   : > { %p1148_p4 = pnand %p1147_p10, %p1143_p8 }
 0x148   : > { %1151 = shalt.err (!%p1148_p4)
}
 0x149   : > { %907 = dma.vmem_to_hbm [thread:$0]  (%p1458_p7), %s1553_s14, 64, %s1551_s4, %s583_s2   ;;  %v567_v22 = vpop.f32.mrf.mxu1 }
 0x14a   : > { %s430_s22 = scalar_lea.vmem [#allocation13], %s1535_s16  ;;  %s423_s17 = scalar_lea.vmem [#allocation11], %s1535_s16 }
 0x14b   : > { %581 = vst.msk [vmem:[%s430_s22] sm:$0xf] %vm571_vm2, %v580_v21  ;;  %v894_v23 = vpop.f32.mrf.mxu1  ;;  %s623_s15 = sshll.u32 %s423_s17, 4  ;;  %s638_s20 = sshll.u32 %s430_s22, 4  ;;  %s1586_s15 = int_to_ptr.vmem [resolvable:$true] %s623_s15  ;;  %s1594_s20 = int_to_ptr.vmem [resolvable:$true] %s638_s20 }
 0x14c   : > { %s1719_s23 = sld [smem:[#allocation28_spill]]  ;;  %s1599_s16 = scalar_lea.sflag [#allocation12], %s371_s5 }
 0x14d   : > { %s1720_s2 = sld [smem:[#allocation29_spill]]  ;;  %s1152_s6 = scalar_lea.vmem %s1586_s15, 64 }
 0x14e   : > { %p1153_p5 = scmp.ne.s32.totalorder %s1586_s15, %s1152_s6  ;;  %s1302_s7 = smov [#allocation11]  }
 0x14f   : > { %s1156_s30 = sshll.u32 %s1302_s7, 4  ;;  %s1157_s30 = int_to_ptr.vmem [resolvable:$false] %s1156_s30 }
 0x150   : > { %p1154_p9 = pnand %p1153_p5, %p1458_p7  ;;  %s1158_s22 = scalar_lea.vmem %s1157_s30, 128 }
 0x151   : > { %p1159_p0 = scmp.lt.s32.totalorder %s1586_s15, %s1157_s30  ;;  %p1160_p1 = scmp.lt.s32.totalorder %s1158_s22, %s1152_s6 }
 0x152   : > { %s1584_s27 = scalar_lea.hbm %s1719_s23, %s1541_s24  ;;  %p1155_p12 = pneg %p1154_p9 }
 0x153   : > { %s1592_s21 = scalar_lea.hbm %s1720_s2, %s1541_s24  ;;  %p1161_p2 = por %p1160_p1, %p1159_p0 }
 0x155   : > { %p1162_p6 = pnand %p1161_p2, %p1155_p12 }
 0x1ae   : > { %v577_v24 = vpop.permute.xlu0 %576 }
 0x1af   : > { %579 = vst.msk [vmem:[%s423_s17] sm:$0xf] %vm571_vm2, %v577_v24 }
 0x1b0   : > { %1165 = shalt.err (!%p1162_p6)
}
 0x1b1   : > { %s1166_s13 = scalar_lea.hbm %s1584_s27, 64  ;;  %s1170_s17 = scalar_lea.hbm %s1719_s23, 256 }
 0x1b2   : > { %p1167_p11 = scmp.ne.s32.totalorder %s1584_s27, %s1166_s13  ;;  %p1171_p3 = scmp.lt.s32.totalorder %s1584_s27, %s1719_s23 }
 0x1b3   : > { %p1172_p10 = scmp.lt.s32.totalorder %s1170_s17, %s1166_s13 }
 0x1b4   : > { %p1168_p8 = pnand %p1167_p11, %p1458_p7 }
 0x1b5   : > { %p1173_p4 = por %p1172_p10, %p1171_p3 }
 0x1b6   : > { %p1169_p13 = pneg %p1168_p8 }
 0x1b8   : > { %p1174_p5 = pnand %p1173_p4, %p1169_p13 }
 0x1ba   : > { %1177 = shalt.err (!%p1174_p5)
}
 0x1bb   : > { %908 = dma.vmem_to_hbm [thread:$0]  (%p1458_p7), %s1586_s15, 64, %s1584_s27, %s1599_s16  }
 0x1bc   : > { %s1178_s14 = scalar_lea.vmem %s1594_s20, 64  ;;  %s1303_s4 = smov [#allocation13]  }
 0x1bd   : > { %p1179_p9 = scmp.ne.s32.totalorder %s1594_s20, %s1178_s14  ;;  %s1182_s6 = sshll.u32 %s1303_s4, 4  ;;  %s1183_s6 = int_to_ptr.vmem [resolvable:$false] %s1182_s6 }
 0x1be   : > { %s1184_s7 = scalar_lea.vmem %s1183_s6, 128  ;;  %p1185_p1 = scmp.lt.s32.totalorder %s1594_s20, %s1183_s6 }
 0x1bf   : > { %p1180_p12 = pnand %p1179_p9, %p1458_p7  ;;  %p1186_p2 = scmp.lt.s32.totalorder %s1184_s7, %s1178_s14 }
 0x1c1   : > { %p1181_p0 = pneg %p1180_p12  ;;  %p1187_p6 = por %p1186_p2, %p1185_p1 }
 0x1c3   : > { %p1188_p11 = pnand %p1187_p6, %p1181_p0 }
 0x1c5   : > { %1191 = shalt.err (!%p1188_p11)
}
 0x1c6   : > { %s1192_s30 = scalar_lea.hbm %s1592_s21, 64  ;;  %s1196_s22 = scalar_lea.hbm %s1720_s2, 256 }
 0x1c7   : > { %p1193_p8 = scmp.ne.s32.totalorder %s1592_s21, %s1192_s30  ;;  %p1197_p10 = scmp.lt.s32.totalorder %s1592_s21, %s1720_s2 }
 0x1c8   : > { %p1198_p4 = scmp.lt.s32.totalorder %s1196_s22, %s1192_s30 }
 0x1c9   : > { %p1194_p13 = pnand %p1193_p8, %p1458_p7 }
 0x1ca   : > { %p1199_p5 = por %p1198_p4, %p1197_p10 }
 0x1cb   : > { %p1195_p3 = pneg %p1194_p13 }
 0x1cd   : > { %p1200_p9 = pnand %p1199_p5, %p1195_p3 }
 0x1cf   : > { %1203 = shalt.err (!%p1200_p9)
}
 0x1d0   : > { %909 = dma.vmem_to_hbm [thread:$0]  (%p1458_p7), %s1594_s20, 64, %s1592_s21, %s1599_s16  }
 0x1d1 PF: > { %s1721_s24 = sld [smem:[#allocation20_spill]]  ;;  %p942_p12 = scmp.ge.s32.totalorder %s1290_s12, 2 }
 0x1d2   : > { %s1722_s17 = sld [smem:[#allocation21_spill]] }
 0x1d7   : > { %s650_s18 = sand.u32 1, %s1721_s24  }
 0x1d8   : > { %p1723_p0 = scmp.ne.s32.totalorder %s1722_s17, 0  ;;  %s651_s19 = scalar_lea.sflag [#allocation4], %s650_s18 }
 0x1da   : > { %p928_p1 = pnand %p942_p12, %p1723_p0 }
 0x1dc   : > { %p929_p2 = pneg %p928_p1 }
 0x1de   : > { %1253 = dma.done.wait (%p929_p2), %s651_s19, 64  }
 0x1df   : > { %1255 = vsyncadd (%p929_p2), %s651_s19, 4294967232  ;;  %s1724_s14 = sadd.s32 4294967294, %s1290_s12  }
 0x1e0   : > { %s659_s4 = sand.u32 1, %s1724_s14  }
 0x1e1   : > { %s660_s9 = scalar_lea.sflag [#allocation12], %s659_s4 }
 0x1e2   : > { %1257 = dma.done.wait (%p929_p2), %s660_s9, 128  }
 0x1e3   : > { %1259 = vsyncadd (%p929_p2), %s660_s9, 4294967168  ;;  %s32_s12 = sadd.s32 1, %s1290_s12   ;;  %s1725_s20 = sld [smem:[#allocation22_spill]] }
 0x1e4   : > { %p29_p7 = scmp.ge.s32.totalorder %s32_s12, 6   ;;  %s1726_s27 = smov %s1266_s28 }
 0x1e5   : > { %s1727_s28 = smov %s1270_s29  ;;  %s1728_s29 = smov %s1474_s8 }
 0x1e6   : > { %s1729_s30 = smov %s1282_s10  ;;  %s1730_s9 = smov %s1286_s11 }
 0x1e7   : > { %s1732_s11 = smov %s1738_s26  ;;  %31 = sbr.rel (!%p29_p7) target bundleno = 19 (0x13), region = 142 }
 0x1e9   : > { %s1731_s10 = smov %s1725_s20 }
 0x1ec   :  { %674 = vsyncpa [#allocation3], 1 }
 0x1ed   :  { %676 = vsyncpa [#allocation3 + $0x1], 1 }
 0x1ee   :  { %677 = vsyncpa [#allocation6], 1 }
 0x1ef   :  { %679 = vsyncpa [#allocation6 + $0x1], 1 }
 0x1f0   :  { %680 = vsyncpa [#allocation9], 1 }
 0x1f1   :  { %681 = vsyncpa [#allocation4], 1 }
 0x1f2   :  { %683 = vsyncpa [#allocation4 + $0x1], 1 }
 0x1f3   :  { %684 = vsyncpa [#allocation12], 1 }
 0x1f4   :  { %686 = vsyncpa [#allocation12 + $0x1], 1 }

</bundles_post_ra>
